<compile_context>
chip_gen: v5e
topology: v5e:2x2
jax: 0.10.0
libtpu: 0.0.40
codegen_flags: <defaults>
</compile_context>

<pallas_src>
import functools

import jax
import jax.numpy as jnp
from jax import lax
from jax.experimental import pallas as pl
from jax.experimental.pallas import tpu as pltpu


_VMEM_LIMIT_BYTES = 32 * 1024 * 1024     # explicit scoped-VMEM budget, safe on v5e/v6e/v7x
_TILE_TARGET_BYTES = 4 * 1024 * 1024     # ~4 MiB tiles amortize the ~0.35 us/grid-step overhead
_MAX_BLOCK_ROWS = 2048


def _choose_block_m(m, c, itemsize):
    """Largest row tile (multiple of 8, <= 2048 rows, ~4 MiB) so that the
    double-buffered input+output blocks stay well under the VMEM limit
    (re-derived from C and dtype rather than hardcoded, per-generation safe)."""
    bm = (_TILE_TARGET_BYTES // max(1, c * itemsize)) // 8 * 8
    bm = max(8, min(_MAX_BLOCK_ROWS, bm))
    if m <= bm:
        return m  # single full-extent block (always layout-legal)
    return bm


def _leaky_relu(x, neg_slope):
    return jnp.where(x >= 0, x, x * neg_slope)


def _hash_u32(v):
    """lowbias32 integer hash (elementwise, uint32). Pure VPU ops -> lowers on
    TPU and in interpret mode alike."""
    v = v ^ (v >> jnp.uint32(16))
    v = v * jnp.uint32(0x7FEB352D)
    v = v ^ (v >> jnp.uint32(15))
    v = v * jnp.uint32(0x846CA68B)
    v = v ^ (v >> jnp.uint32(16))
    return v


# ---------------------------------------------------------------------------
# Pass 1: per-channel sum / sum-of-squares of LeakyReLU(x), reduced over rows.
# ---------------------------------------------------------------------------
def _stats_kernel(x_ref, sum_ref, sumsq_ref, *, neg_slope, block_m, total_m):
    i = pl.program_id(0)

    @pl.when(i == 0)
    def _init():
        sum_ref[...] = jnp.zeros_like(sum_ref)
        sumsq_ref[...] = jnp.zeros_like(sumsq_ref)

    a = _leaky_relu(x_ref[...], neg_slope).astype(jnp.float32)

    if total_m % block_m != 0:
        # Tail tile: rows past the end of the array hold unspecified pad data.
        row = lax.broadcasted_iota(jnp.int32, a.shape, 0)
        a = jnp.where(row + i * block_m < total_m, a, 0.0)

    sum_ref[...] += jnp.sum(a, axis=0, keepdims=True)
    sumsq_ref[...] += jnp.sum(a * a, axis=0, keepdims=True)


# ---------------------------------------------------------------------------
# Pass 2: out = dropout(scale * LeakyReLU(x) + shift)
# ---------------------------------------------------------------------------
def _apply_kernel(seed_ref, x_ref, sum_ref, sumsq_ref, gamma_ref, beta_ref, o_ref,
                  *, eps, neg_slope, total_m, num_cols, block_m,
                  dropout_rate, deterministic):
    a = _leaky_relu(x_ref[...], neg_slope).astype(jnp.float32)

    # Fold BN statistics + affine params into per-channel scale/shift. This is
    # a (1, C) computation per tile (rsqrt on the EUP) — negligible next to the
    # tile DMA — and keeps every tile independent ("parallel" grid axis).
    inv_m = 1.0 / total_m
    mean = sum_ref[...] * inv_m
    var = jnp.maximum(sumsq_ref[...] * inv_m - mean * mean, 0.0)  # biased, as torch BN training
    scale = gamma_ref[...] * lax.rsqrt(var + eps)
    shift = beta_ref[...] - mean * scale

    y = a * scale + shift

    if (not deterministic) and dropout_rate > 0.0:
        # Fused training-mode dropout. Stateless counter-based hash PRNG on the
        # global element index (tiling-invariant, no extra HBM pass, no
        # TPU-only PRNG primitives).
        i = pl.program_id(0)
        row = (lax.broadcasted_iota(jnp.int32, y.shape, 0)
               + i * block_m).astype(jnp.uint32)
        col = lax.broadcasted_iota(jnp.uint32, y.shape, 1)
        idx = row * jnp.uint32(num_cols) + col
        seed_u = seed_ref[0].astype(jnp.uint32)
        h = _hash_u32(idx + seed_u * jnp.uint32(0x9E3779B9))
        # Low 24 bits -> uniform integer in [0, 2^24); keep iff r >= p * 2^24.
        r = h & jnp.uint32((1 << 24) - 1)
        drop_thresh = jnp.uint32(int(round(dropout_rate * (1 << 24))))
        keep = r >= drop_thresh
        y = jnp.where(keep, y * (1.0 / (1.0 - dropout_rate)), 0.0)

    o_ref[...] = y.astype(o_ref.dtype)


def lrelu_bn_drop(x, gamma, beta, *, eps=1e-5, negative_slope=0.01,
                  dropout_rate=0.1, seed=0, deterministic=False,
                  return_stats=False, block_rows=None):
    """LeakyReLU -> BatchNorm1d (training batch stats) -> Dropout.

    x: (N, C) with C = features (native layout, no transposes).
    gamma, beta: (C,) BatchNorm affine parameters.
    deterministic=True disables dropout (for testing / eval of the drop stage).
    return_stats=True additionally returns the biased batch (mean, var) per
    channel, for callers that maintain running statistics.
    block_rows optionally overrides the auto-chosen row tile (testing).
    """
    assert x.ndim == 2, "expected (batch, features) input for BatchNorm1d"
    m, c = x.shape
    itemsize = jnp.dtype(x.dtype).itemsize
    if block_rows is not None:
        bm = max(8, (int(block_rows) // 8) * 8)
        block_m = m if m <= bm else bm
    else:
        block_m = _choose_block_m(m, c, itemsize)
    num_tiles = pl.cdiv(m, block_m)

    gamma2d = gamma.reshape(1, c).astype(jnp.float32)
    beta2d = beta.reshape(1, c).astype(jnp.float32)

    # ---- pass 1: per-channel sum / sumsq of LeakyReLU(x) ----
    sum_, sumsq = pl.pallas_call(
        functools.partial(_stats_kernel, neg_slope=float(negative_slope),
                          block_m=block_m, total_m=m),
        out_shape=(jax.ShapeDtypeStruct((1, c), jnp.float32),
                   jax.ShapeDtypeStruct((1, c), jnp.float32)),
        grid_spec=pltpu.PrefetchScalarGridSpec(
            num_scalar_prefetch=0,
            grid=(num_tiles,),
            in_specs=[pl.BlockSpec((block_m, c), lambda i: (i, 0))],
            out_specs=(pl.BlockSpec((1, c), lambda i: (0, 0)),
                       pl.BlockSpec((1, c), lambda i: (0, 0))),
        ),
        compiler_params=pltpu.CompilerParams(
            dimension_semantics=("arbitrary",),      # accumulator across row tiles
            vmem_limit_bytes=_VMEM_LIMIT_BYTES,
        ),
        cost_estimate=pl.CostEstimate(
            flops=4 * m * c, transcendentals=0,
            bytes_accessed=m * c * itemsize + 2 * c * 4),
    )(x)
    # TODO(synk): on v7x, split this reduction over the 2 TensorCores (parallel
    # leading axis with per-core partial sums combined in pass 2).

    # ---- pass 2: normalize + affine + fused dropout, tiled & parallel ----
    seed_arr = jnp.asarray([seed], dtype=jnp.int32)
    out = pl.pallas_call(
        functools.partial(_apply_kernel, eps=float(eps),
                          neg_slope=float(negative_slope), total_m=float(m),
                          num_cols=int(c), block_m=int(block_m),
                          dropout_rate=float(dropout_rate),
                          deterministic=bool(deterministic)),
        out_shape=jax.ShapeDtypeStruct((m, c), x.dtype),
        grid_spec=pltpu.PrefetchScalarGridSpec(
            num_scalar_prefetch=1,                    # dropout seed lands in SMEM
            grid=(num_tiles,),
            in_specs=[
                pl.BlockSpec((block_m, c), lambda i, s: (i, 0)),
                pl.BlockSpec((1, c), lambda i, s: (0, 0)),
                pl.BlockSpec((1, c), lambda i, s: (0, 0)),
                pl.BlockSpec((1, c), lambda i, s: (0, 0)),
                pl.BlockSpec((1, c), lambda i, s: (0, 0)),
            ],
            out_specs=pl.BlockSpec((block_m, c), lambda i, s: (i, 0)),
        ),
        compiler_params=pltpu.CompilerParams(
            dimension_semantics=("parallel",),        # independent tiles -> both TCs on v7x
            vmem_limit_bytes=_VMEM_LIMIT_BYTES,
        ),
        cost_estimate=pl.CostEstimate(
            flops=12 * m * c, transcendentals=c * num_tiles,
            bytes_accessed=2 * m * c * itemsize + 16 * c),
    )(seed_arr, x, sum_, sumsq, gamma2d, beta2d)

    if return_stats:
        mean = (sum_ / m).reshape(c)
        var = jnp.maximum(sumsq / m - (sum_ / m) ** 2, 0.0).reshape(c)
        return out, mean, var
    return out


def _reference(x, gamma, beta, eps, negative_slope):
    """Pure-JAX reference: LeakyReLU -> training-mode BatchNorm1d (no dropout)."""
    a = jnp.where(x >= 0, x, x * negative_slope).astype(jnp.float32)
    mean = jnp.mean(a, axis=0, keepdims=True)
    var = jnp.mean((a - mean) ** 2, axis=0, keepdims=True)      # biased
    y = (a - mean) * lax.rsqrt(var + eps) * gamma.reshape(1, -1) + beta.reshape(1, -1)
    return y.astype(x.dtype)


if __name__ == "__main__":
    key = jax.random.PRNGKey(0)
    kx, kg, kb = jax.random.split(key, 3)

    # BatchNorm1d(features): input is (batch, features). Small shapes; the
    # block_rows override forces multiple tiles + a ragged tail so the tiled /
    # masked paths are exercised.
    N, F = 296, 128
    eps, slope, p = 1e-5, 0.01, 0.1
    BLOCK_ROWS = 128

    x = jax.random.normal(kx, (N, F), dtype=jnp.float32)
    gamma = 1.0 + 0.1 * jax.random.normal(kg, (F,), dtype=jnp.float32)
    beta = 0.1 * jax.random.normal(kb, (F,), dtype=jnp.float32)

    # (1) dropout disabled -> must match the LeakyReLU+BN reference exactly.
    out = lrelu_bn_drop(x, gamma, beta, eps=eps, negative_slope=slope,
                        dropout_rate=p, deterministic=True,
                        block_rows=BLOCK_ROWS)
    out = jax.block_until_ready(out)
    ref = _reference(x, gamma, beta, eps, slope)
    assert out.shape == (N, F)
    assert jnp.allclose(out, ref, atol=1e-4, rtol=1e-4), \
        float(jnp.max(jnp.abs(out - ref)))

    # (2) training-mode dropout: each element is either 0 or ref/(1-p), and the
    #     empirical drop fraction is ~p.
    out_d = lrelu_bn_drop(x, gamma, beta, eps=eps, negative_slope=slope,
                          dropout_rate=p, seed=123, deterministic=False,
                          block_rows=BLOCK_ROWS)
    out_d = jax.block_until_ready(out_d)
    ref_scaled = ref / (1.0 - p)
    is_zero = jnp.abs(out_d) <= 1e-6
    matches = jnp.abs(out_d - ref_scaled) <= (1e-4 + 1e-4 * jnp.abs(ref_scaled))
    assert bool(jnp.all(is_zero | matches))
    drop_frac = float(jnp.mean(is_zero.astype(jnp.float32)))
    assert 0.04 <= drop_frac <= 0.18, drop_frac

    print("KERNEL_OK")
</pallas_src>

<mosaic_0001>
module attributes {stable_mosaic.version = 11 : i64} {
  func.func @_stats_kernel(%arg0: i32, %arg1: memref<128x128xf32, #tpu.memory_space<vmem>>, %arg2: memref<1x128xf32, #tpu.memory_space<vmem>>, %arg3: memref<1x128xf32, #tpu.memory_space<vmem>>) attributes {dimension_semantics = [#tpu.dimension_semantics<arbitrary>], iteration_bounds = array<i64: 3>, scalar_prefetch = 0 : i64, scratch_operands = 0 : i64, tpu.core_type = #tpu.core_type<tc>, window_params = [{transform_indices = @transform_0, window_bounds = array<i64: 128, 128>}, {pipeline_mode = #tpu.pipeline_mode<synchronous>, transform_indices = @transform_1, window_bounds = array<i64: 1, 128>}, {pipeline_mode = #tpu.pipeline_mode<synchronous>, transform_indices = @transform_2, window_bounds = array<i64: 1, 128>}]} {
    %c0_i32 = arith.constant 0 : i32
    %0 = arith.cmpi eq, %arg0, %c0_i32 : i32
    %1 = arith.extui %0 : i1 to i32
    %c0_i32_0 = arith.constant 0 : i32
    %2 = arith.cmpi ne, %1, %c0_i32_0 : i32
    scf.if %2 {
      %cst_14 = arith.constant 0.000000e+00 : f32
      %28 = vector.broadcast %cst_14 : f32 to vector<1x128xf32>
      %c0_15 = arith.constant 0 : index
      %c0_16 = arith.constant 0 : index
      %29 = vector.load %arg2[%c0_15, %c0_16] : memref<1x128xf32, #tpu.memory_space<vmem>>, vector<1x128xf32>
      tpu.vector_store %arg2[%c0_15, %c0_16], %28 {strides = array<i32>} : memref<1x128xf32, #tpu.memory_space<vmem>>, vector<1x128xf32>,
      %cst_17 = arith.constant 0.000000e+00 : f32
      %30 = vector.broadcast %cst_17 : f32 to vector<1x128xf32>
      %c0_18 = arith.constant 0 : index
      %c0_19 = arith.constant 0 : index
      %31 = vector.load %arg3[%c0_18, %c0_19] : memref<1x128xf32, #tpu.memory_space<vmem>>, vector<1x128xf32>
      tpu.vector_store %arg3[%c0_18, %c0_19], %30 {strides = array<i32>} : memref<1x128xf32, #tpu.memory_space<vmem>>, vector<1x128xf32>,
    } else {
    }
    %c0 = arith.constant 0 : index
    %c0_1 = arith.constant 0 : index
    %3 = vector.load %arg1[%c0, %c0_1] : memref<128x128xf32, #tpu.memory_space<vmem>>, vector<128x128xf32>
    %cst = arith.constant 0.000000e+00 : f32
    %4 = vector.broadcast %cst : f32 to vector<128x128xf32>
    %5 = arith.cmpf oge, %3, %4 : vector<128x128xf32>
    %cst_2 = arith.constant 0.00999999977 : f32
    %6 = vector.broadcast %cst_2 : f32 to vector<128x128xf32>
    %7 = arith.mulf %3, %6 : vector<128x128xf32>
    %8 = arith.select %5, %3, %7 : vector<128x128xi1>, vector<128x128xf32>
    %9 = tpu.iota {dimensions = array<i32: 0>} : vector<128x128xi32>
    %c128_i32 = arith.constant 128 : i32
    %10 = arith.muli %arg0, %c128_i32 : i32
    %11 = vector.broadcast %10 : i32 to vector<128x128xi32>
    %12 = arith.addi %9, %11 : vector<128x128xi32>
    %c296_i32 = arith.constant 296 : i32
    %13 = vector.broadcast %c296_i32 : i32 to vector<128x128xi32>
    %14 = arith.cmpi slt, %12, %13 : vector<128x128xi32>
    %cst_3 = arith.constant 0.000000e+00 : f32
    %15 = vector.broadcast %cst_3 : f32 to vector<128x128xf32>
    %16 = arith.select %14, %8, %15 : vector<128x128xi1>, vector<128x128xf32>
    %c0_4 = arith.constant 0 : index
    %c0_5 = arith.constant 0 : index
    %17 = vector.load %arg2[%c0_4, %c0_5] : memref<1x128xf32, #tpu.memory_space<vmem>>, vector<1x128xf32>
    %cst_6 = arith.constant dense<0.000000e+00> : vector<128xf32>
    %18 = vector.multi_reduction <add>, %16, %cst_6 [0] : vector<128x128xf32> to vector<128xf32>
    %19 = vector.shape_cast %18 : vector<128xf32> to vector<1x128xf32>
    %20 = arith.addf %17, %19 : vector<1x128xf32>
    %c0_7 = arith.constant 0 : index
    %c0_8 = arith.constant 0 : index
    %21 = vector.load %arg2[%c0_7, %c0_8] : memref<1x128xf32, #tpu.memory_space<vmem>>, vector<1x128xf32>
    tpu.vector_store %arg2[%c0_7, %c0_8], %20 {strides = array<i32>} : memref<1x128xf32, #tpu.memory_space<vmem>>, vector<1x128xf32>,
    %c0_9 = arith.constant 0 : index
    %c0_10 = arith.constant 0 : index
    %22 = vector.load %arg3[%c0_9, %c0_10] : memref<1x128xf32, #tpu.memory_space<vmem>>, vector<1x128xf32>
    %23 = arith.mulf %16, %16 : vector<128x128xf32>
    %cst_11 = arith.constant dense<0.000000e+00> : vector<128xf32>
    %24 = vector.multi_reduction <add>, %23, %cst_11 [0] : vector<128x128xf32> to vector<128xf32>
    %25 = vector.shape_cast %24 : vector<128xf32> to vector<1x128xf32>
    %26 = arith.addf %22, %25 : vector<1x128xf32>
    %c0_12 = arith.constant 0 : index
    %c0_13 = arith.constant 0 : index
    %27 = vector.load %arg3[%c0_12, %c0_13] : memref<1x128xf32, #tpu.memory_space<vmem>>, vector<1x128xf32>
    tpu.vector_store %arg3[%c0_12, %c0_13], %26 {strides = array<i32>} : memref<1x128xf32, #tpu.memory_space<vmem>>, vector<1x128xf32>,
    return
  }
  func.func @transform_0(%arg0: i32) -> (i32, i32) {
    %c0_i32 = arith.constant 0 : i32
    %c0_i32_0 = arith.constant 0 : i32
    return %arg0, %c0_i32 : i32, i32
  }
  func.func @transform_1(%arg0: i32) -> (i32, i32) {
    %c0_i32 = arith.constant 0 : i32
    %c0_i32_0 = arith.constant 0 : i32
    %c0_i32_1 = arith.constant 0 : i32
    return %c0_i32, %c0_i32_0 : i32, i32
  }
  func.func @transform_2(%arg0: i32) -> (i32, i32) {
    %c0_i32 = arith.constant 0 : i32
    %c0_i32_0 = arith.constant 0 : i32
    %c0_i32_1 = arith.constant 0 : i32
    return %c0_i32, %c0_i32_0 : i32, i32
  }
}

</mosaic_0001>

<bundles_post_ra>
// kernel: tpu_custom_call.1
= control target key start
LH: loop header
LB: loop body
LE: loop exit
PB: predicated region body
PF: predicated region fallthrough
CT: control target
= control target key end

     0   :  { %8 = vsyncpa [#allocation3], 0  ;;  %s948_s0 = inlined_call_operand.hbm [shape: f32[296,128], index: 0, kind: input, shape index: {}]   ;;  %s949_s1 = inlined_call_operand.hbm [shape: f32[1,128], index: 1, kind: output, shape index: {0}]   ;;  %s950_s2 = inlined_call_operand.hbm [shape: f32[1,128], index: 2, kind: output, shape index: {1}]  }
   0x1   :  { %10 = vsyncpa [#allocation3 + $0x1], 0 }
   0x2   :  { %11 = vsyncpa [#allocation4], 0 }
   0x3   :  { %12 = vsyncpa [#allocation7], 0  ;;  %s678_s9 = smov 0   ;;  %s680_s10 = smov 0  }
   0x4   :  { %s682_s11 = smov 0   ;;  %s684_s12 = smov 0  }
   0x5 LB: > { %s697_s13 = sadd.s32 4294967295, %s655_s12   ;;  %s700_s14 = sadd.s32 1, %s655_s12   ;;  %s655_s12 = sphi %s684_s12, %s956_s12   ;;  %s651_s11 = sphi %s682_s11, %s955_s11   ;;  %s647_s10 = sphi %s680_s10, %s954_s10   ;;  %s643_s9 = sphi %s678_s9, %s953_s9  }
   0x6   : > { %s22_s15 = ssub.s32 %s655_s12, %s700_s14  ;;  %s25_s16 = sadd.s32 1, %s651_s11 }
   0x7   : > { %p23_p0 = scmp.eq.s32.totalorder %s22_s15, 0  ;;  %p32_p1 = scmp.ne.s32.totalorder %s651_s11, %s647_s10 }
   0x8   : > { %p33_p2 = scmp.eq.s32.totalorder %s655_s12, 0  ;;  %p38_p3 = scmp.ne.s32.totalorder %s647_s10, %s643_s9 }
   0x9   : > { %s710_s17 = scalar_select %p23_p0, %s651_s11, %s25_s16  }
   0xa   : > { %p34_p4 = por %p33_p2, %p32_p1  ;;  %p39_p5 = scmp.eq.s32.totalorder %s697_s13, 0 }
   0xb   : > { %p449_p7 = scmp.ge.s32.totalorder %s655_s12, 3 }
   0xc   : > { %p713_p6 = por %p39_p5, %p38_p3 }
   0xd   : > { %100 = sbr.rel (%p449_p7) target bundleno = 54 (0x36), region = 16 }
  0x12   : > { %103 = sbr.rel (!%p34_p4) target bundleno = 54 (0x36), region = 20  ;;  %s104_s19 = sand.u32 (%p34_p4), 1, %s651_s11  }
  0x13   : > { %s451_s20 = sshll.u32 (%p34_p4), %s655_s12, 4  ;;  %s450_s21 = sshll.u32 (%p34_p4), %s104_s19, 7 }
  0x14   : > { %s110_s22 = ssub.s32 (%p34_p4), 37, %s451_s20  ;;  %s723_s26 = scalar_lea.sflag (%p34_p4), [#allocation3], %s104_s19 }
  0x15   : > { %p111_p8 = scmp.lt.s32.totalorder (%p34_p4), %s110_s22, 16  ;;  %s108_s27 = scalar_lea.vmem (%p34_p4), [#allocation2], %s450_s21 }
  0x17   : > { %s958_s22 = smov (!%p111_p8, %s110_s22), 16 }
  0x18   : > { %s452_s23 = sshll.u32 %s958_s22, 3 }
  0x19   : > { %s114_s24 = ssub.s32 128, %s452_s23 }
  0x1a   : > { %s115_s25 = sshll.u32 %s114_s24, 4 }
  0x1b   : > { %116 = vsyncadd %s723_s26, %s115_s25  ;;  %p726_p9 = scmp.ne.s32.totalorder %s452_s23, 0  ;;  %s467_s29 = sshll.u32 %s655_s12, 7 }
  0x1c   : > { %s119_s4 = scalar_lea.hbm %s948_s0, %s467_s29  ;;  %s734_s5 = sshll.u32 %s108_s27, 4  ;;  %s124_s5 = int_to_ptr.vmem [resolvable:$true] %s734_s5 }
  0x1d   : > { %s121_s6 = sshll.u32 %s119_s4, 4  ;;  %s456_s7 = sshll.u32 %s958_s22, 7  ;;  %s737_s6 = int_to_ptr.hbm [resolvable:$true] %s121_s6 }
  0x1e   : > { %s518_s8 = sshra.s32 %s737_s6, 4  ;;  %s520_s9 = sshrl.u32 %s456_s7, 4  ;;  %s519_s8 = int_to_ptr.hbm [resolvable:$true] %s518_s8 }
  0x1f   : > { %s525_s15 = scalar_lea.hbm %s519_s8, %s520_s9  ;;  %s529_s20 = scalar_lea.hbm %s948_s0, 296 }
  0x20   : > { %p526_p10 = scmp.ne.s32.totalorder %s519_s8, %s525_s15  ;;  %p530_p13 = scmp.lt.s32.totalorder %s519_s8, %s948_s0 }
  0x21   : > { %p531_p0 = scmp.lt.s32.totalorder %s529_s20, %s525_s15 }
  0x22   : > { %p527_p11 = pnand %p526_p10, %p726_p9 }
  0x23   : > { %p532_p1 = por %p531_p0, %p530_p13 }
  0x24   : > { %p528_p12 = pneg %p527_p11 }
  0x26   : > { %p533_p2 = pnand %p532_p1, %p528_p12 }
  0x28   : > { %536 = shalt.err (!%p533_p2)
}
  0x29   : > { %s537_s24 = sshra.s32 %s124_s5, 4  ;;  %s657_s27 = smov [#allocation2]   ;;  %s538_s24 = int_to_ptr.vmem [resolvable:$true] %s537_s24 }
  0x2a   : > { %s544_s25 = scalar_lea.vmem %s538_s24, %s520_s9  ;;  %s548_s29 = scalar_lea.vmem %s657_s27, 256 }
  0x2b   : > { %p545_p3 = scmp.ne.s32.totalorder %s538_s24, %s544_s25  ;;  %p550_p7 = scmp.lt.s32.totalorder %s548_s29, %s544_s25 }
  0x2d   : > { %p546_p4 = pnand %p545_p3, %p726_p9 }
  0x2f   : > { %p547_p5 = pneg %p546_p4 }
  0x31   : > { %p552_p8 = pnand %p550_p7, %p547_p5 }
  0x33   : > { %555 = shalt.err (!%p552_p8)
}
  0x34   : > { %s658_s30 = smov 128   ;;  %s659_s3 = smov 8  }
  0x35   : > { %129 = dma.hbm_to_vmem [thread:$0]  (%p726_p9), %s737_s6, %s456_s7, %s124_s5, %s723_s26, %s658_s30, %s658_s30, %s659_s3  }
  0x36 PF: > { %p457_p10 = scmp.ge.s32.totalorder %s655_s12, 1  ;;  %p131_p11 = scmp.lt.s32.totalorder %s655_s12, 4 }
  0x38   : > { %p132_p12 = pnand %p457_p10, %p131_p11 }
  0x39   : > { %s137_s4 = sand.u32 (!%p132_p12), 1, %s647_s10  }
  0x3a   : > { %135 = sbr.rel (%p132_p12) target bundleno = 144 (0x90), region = 24  ;;  %s458_s8 = sshll.u32 (!%p132_p12), %s137_s4, 7 }
  0x3b   : > { %s138_s9 = scalar_lea.sflag (!%p132_p12), [#allocation3], %s137_s4  ;;  %s766_s15 = scalar_lea.vmem (!%p132_p12), [#allocation2], %s458_s8 }
  0x3f   : > { %630 = dma.done.wait (%p713_p6), %s138_s9, 2048  }
  0x40   : > { %632 = vsyncadd (%p713_p6), %s138_s9, 4294965248  ;;  %p459_p9 = scmp.ne.s32.totalorder %s697_s13, 0 }
  0x42   : > { %166 = sbr.rel (%p459_p9) target bundleno = 74 (0x4a), region = 32 }
  0x47   : > { %v660_v0 = vmov 0.0  }
  0x48   : > { %167 = vst [vmem:[#allocation5] sm:$0x1] %v660_v0 }
  0x49   : > { %168 = vst [vmem:[#allocation6] sm:$0x1] %v660_v0 }
  0x4a PF: > { %v233_v1 = vlaneseq  ;;  %s460_s12 = sshll.u32 %s697_s13, 7  ;;  %v169_v3 = vld [vmem:[%s766_s15] sm:$0xff]  ;;  %v170_v4 = vld [vmem:[%s766_s15 + $0x8] sm:$0xff]  ;;  %v171_v5 = vld [vmem:[%s766_s15 + $0x10] sm:$0xff]  ;;  %s661_s18 = smov [#allocation5]  }
  0x4b   : > { %v172_v7 = vld [vmem:[%s766_s15 + $0x18] sm:$0xff]  ;;  %v781_v8 = vstv %s460_s12  ;;  %v173_v9 = vld [vmem:[%s766_s15 + $0x20] sm:$0xff]  ;;  %v785_v10 = vld [vmem:[%s766_s15 + $0x28] sm:$0xff]  ;;  %vm185_vm0 = vcmp.ge.f32.partialorder %v169_v3, 0.0  ;;  %vm186_vm1 = vcmp.ge.f32.partialorder %v170_v4, 0.0  ;;  %vm187_vm2 = vcmp.ge.f32.partialorder %v171_v5, 0.0 }
  0x4c   : > { %v773_v2 = vshrl.u32 %v233_v1, 7  ;;  %v789_v12 = vld [vmem:[%s766_s15 + $0x30] sm:$0xff]  ;;  %v201_v13 = vmul.f32 0.01, %v169_v3  ;;  %v202_v14 = vmul.f32 0.01, %v170_v4 }
  0x4d   : > { %v792_v15 = vld [vmem:[%s766_s15 + $0x38] sm:$0xff]  ;;  %v795_v16 = vld [vmem:[%s766_s15 + $0x40] sm:$0xff]  ;;  %vm188_vm3 = vcmp.ge.f32.partialorder %v172_v7, 0.0  ;;  %vm189_vm4 = vcmp.ge.f32.partialorder %v173_v9, 0.0  ;;  %vm190_vm5 = vcmp.ge.f32.partialorder %v785_v10, 0.0  ;;  %v803_v22 = vld [vmem:[%s766_s15 + $0x48] sm:$0xff] }
  0x4e   : > { %v235_v6 = vadd.s32 8, %v773_v2  ;;  %v236_v11 = vadd.s32 16, %v773_v2  ;;  %v237_v17 = vadd.s32 24, %v773_v2  ;;  %v252_v18 = vadd.s32 %v781_v8, %v773_v2  ;;  %v810_v27 = vld [vmem:[%s766_s15 + $0x50] sm:$0xff]  ;;  %v817_v32 = vld [vmem:[%s766_s15 + $0x58] sm:$0xff]  ;;  %v820_v33 = vld [vmem:[%s766_s15 + $0x60] sm:$0xff] }
  0x4f   : > { %v203_v20 = vmul.f32 0.01, %v171_v5  ;;  %v204_v21 = vmul.f32 0.01, %v172_v7  ;;  %vm191_vm6 = vcmp.ge.f32.partialorder %v789_v12, 0.0  ;;  %v238_v25 = vadd.s32 32, %v773_v2 }
  0x50   : > { %v253_v19 = vadd.s32 %v781_v8, %v235_v6  ;;  %v205_v23 = vmul.f32 0.01, %v173_v9  ;;  %v206_v24 = vmul.f32 0.01, %v785_v10  ;;  %v254_v26 = vadd.s32 %v781_v8, %v236_v11  ;;  %v843_v46 = vld [vmem:[%s766_s15 + $0x68] sm:$0xff]  ;;  %s370_s22 = sshll.u32 %s661_s18, 4  ;;  %s371_s22 = int_to_ptr.vmem [resolvable:$true] %s370_s22 }
  0x51   : > { %v207_v28 = vmul.f32 0.01, %v789_v12  ;;  %v208_v29 = vmul.f32 0.01, %v792_v15  ;;  %v217_v30 = vsel %vm185_vm0, %v169_v3, %v201_v13  ;;  %v218_v31 = vsel %vm186_vm1, %v170_v4, %v202_v14  ;;  %s372_s5 = sshll.u32 %s949_s1, 4  ;;  %p477_p6 = scmp.eq.s32.totalorder %s697_s13, 2  ;;  %s373_s5 = int_to_ptr.hbm [resolvable:$true] %s372_s5 }
  0x52   : > { %v239_v34 = vadd.s32 40, %v773_v2  ;;  %v255_v35 = vadd.s32 %v781_v8, %v237_v17  ;;  %vm268_vm7 = vcmp.lt.s32.totalorder %v252_v18, 296  ;;  %vm269_vm8 = vcmp.lt.s32.totalorder %v253_v19, 296  ;;  %v184_v19 = vld [vmem:[%s766_s15 + $0x78] sm:$0xff]  ;;  %s662_s6 = smov [#allocation6]   ;;  %s384_s20 = sshll.u32 %s950_s2, 4  ;;  %s385_s20 = int_to_ptr.hbm [resolvable:$true] %s384_s20 }
  0x53   : > { %vm192_vm9 = vcmp.ge.f32.partialorder %v792_v15, 0.0  ;;  %v209_v36 = vmul.f32 0.01, %v795_v16  ;;  %v827_v37 = vmul.f32 0.01, %v803_v22  ;;  %v240_v38 = vadd.s32 48, %v773_v2 }
  0x54   : > { %vm193_vm10 = vcmp.ge.f32.partialorder %v795_v16, 0.0  ;;  %v832_v39 = vmul.f32 0.01, %v810_v27  ;;  %v219_v40 = vsel %vm187_vm2, %v171_v5, %v203_v20  ;;  %v256_v41 = vadd.s32 %v781_v8, %v238_v25  ;;  %s382_s7 = sshll.u32 %s662_s6, 4  ;;  %s383_s7 = int_to_ptr.vmem [resolvable:$true] %s382_s7 }
  0x55   : > { %vm270_vm11 = vcmp.lt.s32.totalorder %v254_v26, 296  ;;  %v837_v42 = vmul.f32 0.01, %v817_v32  ;;  %v840_v43 = vmul.f32 0.01, %v820_v33  ;;  %v284_v44 = vsel %vm268_vm7, %v217_v30, 0.0 }
  0x56   : > { %v285_v45 = vsel %vm269_vm8, %v218_v31, 0.0  ;;  %vm194_vm12 = vcmp.ge.f32.partialorder %v803_v22, 0.0  ;;  %v220_v47 = vsel %vm188_vm3, %v172_v7, %v204_v21  ;;  %v241_v48 = vadd.s32 56, %v773_v2 }
  0x57   : > { %v257_v49 = vadd.s32 %v781_v8, %v239_v34  ;;  %vm271_vm13 = vcmp.lt.s32.totalorder %v255_v35, 296  ;;  %v221_v50 = vsel %vm189_vm4, %v173_v9, %v205_v23  ;;  %v242_v51 = vadd.s32 64, %v773_v2  ;;  %v183_v9 = vld [vmem:[%s766_s15 + $0x70] sm:$0xff] }
  0x58   : > { %v258_v52 = vadd.s32 %v781_v8, %v240_v38  ;;  %v286_v53 = vsel %vm270_vm11, %v219_v40, 0.0  ;;  %vm195_vm14 = vcmp.ge.f32.partialorder %v810_v27, 0.0  ;;  %vm272_vm15 = vcmp.lt.s32.totalorder %v256_v41, 296 }
  0x59   : > { %v301_v54 = vadd.f32 %v285_v45, %v284_v44  ;;  %v325_v55 = vmul.f32 %v284_v44, %v284_v44  ;;  %v326_v56 = vmul.f32 %v285_v45, %v285_v45  ;;  %v854_v57 = vmul.f32 0.01, %v843_v46 }
  0x5a   : > { %v222_v58 = vsel %vm190_vm5, %v785_v10, %v206_v24  ;;  %v243_v59 = vadd.s32 72, %v773_v2  ;;  %v287_v60 = vsel %vm271_vm13, %v220_v47, 0.0  ;;  %vm196_vm0 = vcmp.ge.f32.partialorder %v817_v32, 0.0 }
  0x5b   : > { %v259_v61 = vadd.s32 %v781_v8, %v241_v48  ;;  %vm273_vm1 = vcmp.lt.s32.totalorder %v257_v49, 296  ;;  %v302_v62 = vadd.f32 %v301_v54, %v286_v53  ;;  %v327_v63 = vmul.f32 %v286_v53, %v286_v53 }
  0x5c   : > { %v223_v0 = vsel %vm191_vm6, %v789_v12, %v207_v28  ;;  %v244_v1 = vadd.s32 80, %v773_v2  ;;  %v260_v3 = vadd.s32 %v781_v8, %v242_v51  ;;  %v288_v4 = vsel %vm272_vm15, %v221_v50, 0.0 }
  0x5d   : > { %vm197_vm2 = vcmp.ge.f32.partialorder %v820_v33, 0.0  ;;  %vm274_vm3 = vcmp.lt.s32.totalorder %v258_v52, 296  ;;  %v303_v5 = vadd.f32 %v302_v62, %v287_v60  ;;  %v328_v6 = vmul.f32 %v287_v60, %v287_v60 }
  0x5e   : > { %v341_v7 = vadd.f32 %v326_v56, %v325_v55  ;;  %v224_v10 = vsel %vm192_vm9, %v792_v15, %v208_v29  ;;  %v245_v11 = vadd.s32 88, %v773_v2  ;;  %v261_v12 = vadd.s32 %v781_v8, %v243_v59 }
  0x5f   : > { %v289_v13 = vsel %vm273_vm1, %v222_v58, 0.0  ;;  %vm198_vm4 = vcmp.ge.f32.partialorder %v843_v46, 0.0  ;;  %vm275_vm5 = vcmp.lt.s32.totalorder %v259_v61, 296  ;;  %v304_v14 = vadd.f32 %v303_v5, %v288_v4 }
  0x60   : > { %v329_v17 = vmul.f32 %v288_v4, %v288_v4  ;;  %v342_v18 = vadd.f32 %v341_v7, %v327_v63  ;;  %v225_v20 = vsel %vm193_vm10, %v795_v16, %v209_v36  ;;  %v246_v21 = vadd.s32 96, %v773_v2 }
  0x61   : > { %v262_v15 = vadd.s32 %v781_v8, %v244_v1  ;;  %v290_v23 = vsel %vm274_vm3, %v223_v0, 0.0  ;;  %vm199_vm6 = vcmp.ge.f32.partialorder %v183_v9, 0.0  ;;  %vm276_vm7 = vcmp.lt.s32.totalorder %v260_v3, 296 }
  0x62   : > { %v305_v24 = vadd.f32 %v304_v14, %v289_v13  ;;  %v330_v25 = vmul.f32 %v289_v13, %v289_v13  ;;  %v343_v26 = vadd.f32 %v342_v18, %v328_v6  ;;  %v226_v28 = vsel %vm194_vm12, %v803_v22, %v827_v37 }
  0x63   : > { %v247_v29 = vadd.s32 104, %v773_v2  ;;  %v263_v16 = vadd.s32 %v781_v8, %v245_v11  ;;  %v291_v30 = vsel %vm275_vm5, %v224_v10, 0.0  ;;  %vm200_vm8 = vcmp.ge.f32.partialorder %v184_v19, 0.0 }
  0x64   : > { %vm277_vm9 = vcmp.lt.s32.totalorder %v261_v12, 296  ;;  %v306_v31 = vadd.f32 %v305_v24, %v290_v23  ;;  %v331_v34 = vmul.f32 %v290_v23, %v290_v23  ;;  %v344_v35 = vadd.f32 %v343_v26, %v329_v17 }
  0x65   : > { %v227_v36 = vsel %vm195_vm14, %v810_v27, %v832_v39  ;;  %v248_v38 = vadd.s32 112, %v773_v2  ;;  %v264_v22 = vadd.s32 %v781_v8, %v246_v21  ;;  %v292_v37 = vsel %vm276_vm7, %v225_v20, 0.0 }
  0x66   : > { %vm278_vm10 = vcmp.lt.s32.totalorder %v262_v15, 296  ;;  %v307_v40 = vadd.f32 %v306_v31, %v291_v30  ;;  %v332_v41 = vmul.f32 %v291_v30, %v291_v30  ;;  %v345_v44 = vadd.f32 %v344_v35, %v330_v25 }
  0x67   : > { %v228_v45 = vsel %vm196_vm0, %v817_v32, %v837_v42  ;;  %v249_v47 = vadd.s32 120, %v773_v2  ;;  %v265_v48 = vadd.s32 %v781_v8, %v247_v29  ;;  %v293_v27 = vsel %vm277_vm9, %v226_v28, 0.0 }
  0x68   : > { %vm279_vm11 = vcmp.lt.s32.totalorder %v263_v16, 296  ;;  %v308_v39 = vadd.f32 %v307_v40, %v292_v37  ;;  %v333_v49 = vmul.f32 %v292_v37, %v292_v37  ;;  %v346_v50 = vadd.f32 %v345_v44, %v331_v34  ;;  %v300_v16 = vld [vmem:[#allocation5] sm:$0x1] }
  0x69   : > { %v215_v51 = vmul.f32 0.01, %v183_v9  ;;  %v229_v52 = vsel %vm197_vm2, %v820_v33, %v840_v43  ;;  %v266_v53 = vadd.s32 %v781_v8, %v248_v38  ;;  %v294_v54 = vsel %vm278_vm10, %v227_v36, 0.0  ;;  %v324_v36 = vld [vmem:[#allocation6] sm:$0x1] }
  0x6a   : > { %vm280_vm12 = vcmp.lt.s32.totalorder %v264_v22, 296  ;;  %v309_v32 = vadd.f32 %v308_v39, %v293_v27  ;;  %v334_v42 = vmul.f32 %v293_v27, %v293_v27  ;;  %v347_v2 = vadd.f32 %v346_v50, %v332_v41 }
  0x6b   : > { %v216_v55 = vmul.f32 0.01, %v184_v19  ;;  %v230_v56 = vsel %vm198_vm4, %v843_v46, %v854_v57  ;;  %v267_v58 = vadd.s32 %v781_v8, %v249_v47  ;;  %v295_v59 = vsel %vm279_vm11, %v228_v45, 0.0 }
  0x6c   : > { %vm281_vm13 = vcmp.lt.s32.totalorder %v265_v48, 296  ;;  %v310_v60 = vadd.f32 %v309_v32, %v294_v54  ;;  %v335_v61 = vmul.f32 %v294_v54, %v294_v54  ;;  %v348_v33 = vadd.f32 %v347_v2, %v333_v49 }
  0x6d   : > { %v231_v43 = vsel %vm199_vm6, %v183_v9, %v215_v51  ;;  %v296_v62 = vsel %vm280_vm12, %v229_v52, 0.0  ;;  %vm282_vm14 = vcmp.lt.s32.totalorder %v266_v53, 296  ;;  %v336_v0 = vmul.f32 %v295_v59, %v295_v59 }
  0x6e   : > { %v311_v63 = vadd.f32 %v310_v60, %v295_v59  ;;  %v349_v1 = vadd.f32 %v348_v33, %v334_v42  ;;  %v232_v3 = vsel %vm200_vm8, %v184_v19, %v216_v55  ;;  %v297_v4 = vsel %vm281_vm13, %v230_v56, 0.0 }
  0x6f   : > { %vm283_vm15 = vcmp.lt.s32.totalorder %v267_v58, 296  ;;  %v337_v46 = vmul.f32 %v296_v62, %v296_v62  ;;  %v298_v8 = vsel %vm282_vm14, %v231_v43, 0.0  ;;  %v338_v7 = vmul.f32 %v297_v4, %v297_v4 }
  0x70   : > { %v312_v5 = vadd.f32 %v311_v63, %v296_v62  ;;  %v350_v57 = vadd.f32 %v349_v1, %v335_v61  ;;  %v299_v11 = vsel %vm283_vm15, %v232_v3, 0.0  ;;  %v339_v13 = vmul.f32 %v298_v8, %v298_v8 }
  0x71   : > { %v340_v17 = vmul.f32 %v299_v11, %v299_v11 }
  0x72   : > { %v313_v6 = vadd.f32 %v312_v5, %v297_v4  ;;  %v351_v10 = vadd.f32 %v350_v57, %v336_v0 }
  0x74   : > { %v314_v12 = vadd.f32 %v313_v6, %v298_v8  ;;  %v352_v9 = vadd.f32 %v351_v10, %v337_v46 }
  0x76   : > { %v315_v14 = vadd.f32 %v314_v12, %v299_v11  ;;  %v353_v18 = vadd.f32 %v352_v9, %v338_v7 }
  0x78   : > { %v316_v20 = vrot.slane %v315_v14, 4  ;;  %v354_v21 = vadd.f32 %v353_v18, %v339_v13 }
  0x7a   : > { %v317_v19 = vadd.f32 %v316_v20, %v315_v14  ;;  %v355_v15 = vadd.f32 %v354_v21, %v340_v17 }
  0x7c   : > { %v318_v23 = vrot.slane %v317_v19, 2  ;;  %v356_v24 = vrot.slane %v355_v15, 4 }
  0x7e   : > { %v319_v25 = vadd.f32 %v318_v23, %v317_v19  ;;  %v357_v26 = vadd.f32 %v356_v24, %v355_v15 }
  0x80   : > { %v320_v28 = vrot.slane %v319_v25, 1  ;;  %v358_v29 = vrot.slane %v357_v26, 2 }
  0x82   : > { %v321_v30 = vadd.f32 %v320_v28, %v319_v25  ;;  %v359_v31 = vadd.f32 %v358_v29, %v357_v26 }
  0x84   : > { %v322_v34 = vadd.f32 %v321_v30, %v300_v16  ;;  %v360_v35 = vrot.slane %v359_v31, 1 }
  0x86   : > { %323 = vst [vmem:[#allocation5] sm:$0x1] %v322_v34  ;;  %v361_v38 = vadd.f32 %v360_v35, %v359_v31 }
  0x87   : > { %470 = dma.vmem_to_hbm [thread:$0]  (%p477_p6), %s371_s22, 16, %s373_s5, [#allocation4]  }
  0x88   : > { %v362_v22 = vadd.f32 %v361_v38, %v324_v36 }
  0x8a   : > { %363 = vst [vmem:[#allocation6] sm:$0x1] %v362_v22 }
  0x8b   : > { %472 = dma.vmem_to_hbm [thread:$0]  (%p477_p6), %s383_s7, 16, %s385_s20, [#allocation7]  }
  0x8c   : > { %634 = dma.done.wait (%p477_p6), [#allocation4], 16  }
  0x8d   : > { %636 = vsyncadd (%p477_p6), [#allocation4], 4294967280 }
  0x8e   : > { %638 = dma.done.wait (%p477_p6), [#allocation7], 16  }
  0x8f   : > { %640 = vsyncadd (%p477_p6), [#allocation7], 4294967280 }
  0x90 PF: > { %p15_p13 = scmp.ge.s32.totalorder %s700_s14, 5   ;;  %s953_s9 = smov %s647_s10 }
  0x91   : > { %s954_s10 = smov %s651_s11  ;;  %s955_s11 = smov %s710_s17 }
  0x92   : > { %s956_s12 = smov %s700_s14  ;;  %17 = sbr.rel (!%p15_p13) target bundleno = 5 (0x5), region = 73 }
  0x97   :  { %403 = vsyncpa [#allocation3], 1 }
  0x98   :  { %405 = vsyncpa [#allocation3 + $0x1], 1 }
  0x99   :  { %406 = vsyncpa [#allocation4], 1 }
  0x9a   :  { %408 = vsyncpa [#allocation4 + $0x1], 1 }
  0x9b   :  { %409 = vsyncpa [#allocation7], 1 }

</bundles_post_ra>
